<compile_context>
chip_gen: v5e
topology: v5e:2x2
jax: 0.10.0
libtpu: 0.0.40
codegen_flags: <defaults>
</compile_context>

<pallas_src>
import jax
import jax.numpy as jnp
from jax.experimental import pallas as pl
from jax.experimental.pallas import tpu as pltpu


# --------------------------------------------------------------- kernels ----

def _linear_kernel_f32out(x_ref, w_ref, b_ref, o_ref):
    """f32 output: accumulate directly into the (K-resident) output block."""
    k = pl.program_id(2)

    @pl.when(k == 0)
    def _():
        # Fold the bias into the accumulator init (no epilogue VPU add).
        o_ref[...] = jnp.broadcast_to(b_ref[...], o_ref.shape)

    x = x_ref[...]
    if x.dtype != w_ref.dtype:          # static decision; narrows x for bf16 weights
        x = x.astype(w_ref.dtype)
    o_ref[...] += jnp.dot(x, w_ref[...], preferred_element_type=jnp.float32)


def _linear_kernel_narrow_out(x_ref, w_ref, b_ref, o_ref, acc_ref):
    """Narrow output dtypes: f32 VMEM scratch accumulator, cast on the last k."""
    k = pl.program_id(2)

    @pl.when(k == 0)
    def _():
        acc_ref[...] = jnp.broadcast_to(b_ref[...], acc_ref.shape)

    x = x_ref[...]
    if x.dtype != w_ref.dtype:
        x = x.astype(w_ref.dtype)
    acc_ref[...] += jnp.dot(x, w_ref[...], preferred_element_type=jnp.float32)

    @pl.when(k == pl.num_programs(2) - 1)
    def _():
        o_ref[...] = acc_ref[...].astype(o_ref.dtype)


# ----------------------------------------------------------- host helpers ---

def _vmem_capacity_bytes():
    try:
        return int(pltpu.get_tpu_info().vmem_capacity_bytes)
    except Exception:
        return 128 << 20  # v5e/v6e default


def _num_tensorcores():
    """Best-effort: 2 TCs on v7x-class chips, else 1."""
    try:
        kind = jax.devices()[0].device_kind.lower()
        if "v7" in kind or "7x" in kind:
            return 2
    except Exception:
        pass
    try:
        # v7x exposes 64 MiB VMEM per core vs 128 MiB on v5e/v6e.
        if _vmem_capacity_bytes() <= (80 << 20):
            return 2
    except Exception:
        pass
    return 1


def _sublane_align(dtype):
    """Sublane packing for the second-to-last dim: 8 f32, 16 bf16, 32 int8/fp8."""
    itemsize = jnp.dtype(dtype).itemsize
    return 8 * max(1, 4 // max(1, itemsize))


def _pick_tile(dim, preferred, align):
    """Largest tile <= preferred, multiple of `align`, dividing dim; else full dim
    (a full-extent block is always a legal block shape)."""
    if dim <= preferred:
        return dim
    t = (preferred // align) * align
    while t >= align:
        if dim % t == 0:
            return t
        t -= align
    return dim


def _working_bytes(tm, tn, tk, x_item, w_item, out_item, needs_acc, nbuf):
    wb = nbuf * (tm * tk * x_item + tk * tn * w_item + tn * 4 + tm * tn * out_item)
    if needs_acc:
        wb += tm * tn * 4
    return wb


# ------------------------------------------------------------------ entry ---

def simple_projector(x, w_t, b, *, tm=None, tn=None, tk=None):
    """y = x @ w_t + b  (PyTorch nn.Linear forward).

    x:   (M, K) input.
    w_t: (K, N) transpose of PyTorch's (N, K) weight.  Its dtype is the MXU
         compute dtype — store it as bf16 once at init for the fast path; a
         wider x is narrowed inside the kernel (no per-call wrapper cast).
    b:   (N,) bias (added in f32).
    """
    M, K = x.shape
    Kw, N = w_t.shape
    assert K == Kw and b.shape == (N,)
    out_dtype = x.dtype
    needs_acc = jnp.dtype(out_dtype) != jnp.dtype(jnp.float32)

    x_item = jnp.dtype(x.dtype).itemsize
    w_item = jnp.dtype(w_t.dtype).itemsize
    out_item = jnp.dtype(out_dtype).itemsize

    b2 = b.reshape(1, N).astype(jnp.float32)

    vmem_cap = _vmem_capacity_bytes()
    vmem_ceiling = int(0.58 * vmem_cap)          # ~37 MiB on v7x, ~74 MiB on v5e/v6e
    num_tc = _num_tensorcores()
    m_align = max(_sublane_align(x.dtype), _sublane_align(out_dtype))

    user_tiles = not (tm is None and tn is None and tk is None)

    # --- Fast path: whole problem fits comfortably in VMEM -------------------
    fast_threshold = min(vmem_ceiling, vmem_cap // 4)   # ~16 MiB v7x, ~32 MiB v5e/v6e
    single_bytes = _working_bytes(M, N, K, x_item, w_item, out_item, needs_acc, nbuf=1)
    use_fast = (not user_tiles) and single_bytes <= fast_threshold

    if use_fast:
        tm, tk = M, K
        if num_tc >= 2 and N % 256 == 0:
            tn = N // 2       # split the "parallel" N axis across both v7x TCs
        else:
            tn = N
    else:
        # Tiled path: prefer large tm/tn (cuts weight / activation re-streams),
        # tk only amortizes per-step overhead.
        if tm is None:
            tm = _pick_tile(M, 512, m_align)
        if tn is None:
            tn = _pick_tile(N, 512, 128)
        if tk is None:
            tk = _pick_tile(K, 1024, 128)
        if not user_tiles:
            # Shrink auto-picked tiles (never the vmem limit) until the
            # double-buffered working set fits the per-generation ceiling.
            pt_m, pt_n, pt_k = tm, tn, tk
            while _working_bytes(tm, tn, tk, x_item, w_item, out_item,
                                 needs_acc, nbuf=2) > vmem_ceiling:
                if pt_k > 128 and tk > 128:
                    pt_k = max(128, pt_k // 2)
                    tk = _pick_tile(K, pt_k, 128)
                elif pt_n > 128 and tn > 128:
                    pt_n = max(128, pt_n // 2)
                    tn = _pick_tile(N, pt_n, 128)
                elif pt_m > m_align and tm > m_align:
                    pt_m = max(m_align, pt_m // 2)
                    tm = _pick_tile(M, pt_m, m_align)
                else:
                    break  # non-factorable dims; full-extent blocks, accept.

    assert M % tm == 0 and N % tn == 0 and K % tk == 0, (
        "tiles must divide (M, N, K)")
    grid = (M // tm, N // tn, K // tk)   # K (reduction) innermost / "arbitrary"
    total_steps = grid[0] * grid[1] * grid[2]

    nbuf = 1 if total_steps == 1 else 2
    working = _working_bytes(tm, tn, tk, x_item, w_item, out_item, needs_acc, nbuf=nbuf)
    # Never clamp the limit below the working set (shrinking happened above).
    vmem_limit = int(max(working + (2 << 20), min(16 << 20, vmem_ceiling)))

    cost = pl.CostEstimate(
        flops=2 * M * K * N,
        # Account for grid re-streaming: W is re-read per M-tile, x per N-tile.
        bytes_accessed=(grid[0] * K * N * w_item
                        + grid[1] * M * K * x_item
                        + M * N * out_item
                        + N * 4),
        transcendentals=0,
    )

    kernel = _linear_kernel_narrow_out if needs_acc else _linear_kernel_f32out
    scratch = [pltpu.VMEM((tm, tn), jnp.float32)] if needs_acc else []

    def _run(minimal_buffering):
        # A 1-step grid cannot pipeline: request single buffering to halve VMEM.
        pm = pl.Buffered(1) if (minimal_buffering and total_steps == 1) else None

        def spec(shape, imap):
            if pm is None:
                return pl.BlockSpec(shape, imap)
            return pl.BlockSpec(shape, imap, pipeline_mode=pm)

        return pl.pallas_call(
            kernel,
            out_shape=jax.ShapeDtypeStruct((M, N), out_dtype),
            grid_spec=pltpu.PrefetchScalarGridSpec(
                num_scalar_prefetch=0,
                grid=grid,
                in_specs=[
                    spec((tm, tk), lambda i, j, k: (i, k)),   # x tile
                    spec((tk, tn), lambda i, j, k: (k, j)),   # weight tile
                    spec((1, tn), lambda i, j, k: (0, j)),    # bias tile (f32)
                ],
                out_specs=spec((tm, tn), lambda i, j, k: (i, j)),
                scratch_shapes=scratch,
            ),
            compiler_params=pltpu.CompilerParams(
                dimension_semantics=("parallel", "parallel", "arbitrary"),
                vmem_limit_bytes=vmem_limit,
            ),
            cost_estimate=cost,
        )(x, w_t, b2)

    if total_steps == 1:
        try:
            return _run(True)
        except Exception:
            # TODO(synk): BlockSpec(pipeline_mode=...) unavailable on this jax;
            # retry with default double buffering.
            return _run(False)
    return _run(False)


if __name__ == "__main__":
    # Small shapes consistent with the module: batch=8, input_dim=128, output_dim=768.
    batch, input_dim, output_dim = 8, 128, 768

    key = jax.random.PRNGKey(0)
    kx, kw, kb = jax.random.split(key, 3)

    # PyTorch-Linear-style init: U(-1/sqrt(K), 1/sqrt(K)).
    bound = 1.0 / jnp.sqrt(jnp.float32(input_dim))
    weight = jax.random.uniform(kw, (output_dim, input_dim), jnp.float32, -bound, bound)
    bias = jax.random.uniform(kb, (output_dim,), jnp.float32, -bound, bound)

    x = jax.random.normal(kx, (batch, input_dim), jnp.float32)
    y_ref = x @ weight.T + bias

    # f32 path.  (MXU f32 matmuls use bf16 passes at default precision, so the
    # comparison tolerance is ~1e-2 absolute on O(1) outputs.)
    w_t = weight.T
    y = jax.block_until_ready(simple_projector(x, w_t, bias))
    assert y.shape == (batch, output_dim)
    assert jnp.allclose(y, y_ref, atol=1e-2, rtol=1e-2)

    # bf16-weight fast path: pre-cast the weight ONCE (outside the hot path);
    # x is narrowed inside the kernel, accumulation and bias stay f32.
    w_t_bf16 = w_t.astype(jnp.bfloat16)
    y_bf16 = jax.block_until_ready(simple_projector(x, w_t_bf16, bias))
    assert jnp.allclose(y_bf16, y_ref, atol=5e-2, rtol=5e-2)

    print("KERNEL_OK")
</pallas_src>

<mosaic_0001>
module attributes {stable_mosaic.version = 11 : i64} {
  func.func @_linear_kernel_f32out(%arg0: i32, %arg1: i32, %arg2: i32, %arg3: memref<8x128xf32, #tpu.memory_space<vmem>>, %arg4: memref<128x768xf32, #tpu.memory_space<vmem>>, %arg5: memref<1x768xf32, #tpu.memory_space<vmem>>, %arg6: memref<8x768xf32, #tpu.memory_space<vmem>>) attributes {dimension_semantics = [#tpu.dimension_semantics<parallel>, #tpu.dimension_semantics<parallel>, #tpu.dimension_semantics<arbitrary>], iteration_bounds = array<i64: 1, 1, 1>, scalar_prefetch = 0 : i64, scratch_operands = 0 : i64, tpu.core_type = #tpu.core_type<tc>, window_params = [{pipeline_mode = #tpu.pipeline_mode<synchronous>, transform_indices = @transform_0, window_bounds = array<i64: 8, 128>}, {pipeline_mode = #tpu.pipeline_mode<synchronous>, transform_indices = @transform_1, window_bounds = array<i64: 128, 768>}, {pipeline_mode = #tpu.pipeline_mode<synchronous>, transform_indices = @transform_2, window_bounds = array<i64: 1, 768>}, {pipeline_mode = #tpu.pipeline_mode<synchronous>, transform_indices = @transform_3, window_bounds = array<i64: 8, 768>}]} {
    %c0_i32 = arith.constant 0 : i32
    %0 = arith.cmpi eq, %arg2, %c0_i32 : i32
    %1 = arith.extui %0 : i1 to i32
    %c0_i32_0 = arith.constant 0 : i32
    %2 = arith.cmpi ne, %1, %c0_i32_0 : i32
    scf.if %2 {
      %c0_8 = arith.constant 0 : index
      %c0_9 = arith.constant 0 : index
      %9 = vector.load %arg5[%c0_8, %c0_9] : memref<1x768xf32, #tpu.memory_space<vmem>>, vector<1x768xf32>
      %10 = vector.shape_cast %9 : vector<1x768xf32> to vector<1x768xf32>
      %11 = vector.broadcast %10 : vector<1x768xf32> to vector<8x768xf32>
      %c0_10 = arith.constant 0 : index
      %c0_11 = arith.constant 0 : index
      %12 = vector.load %arg6[%c0_10, %c0_11] : memref<8x768xf32, #tpu.memory_space<vmem>>, vector<8x768xf32>
      tpu.vector_store %arg6[%c0_10, %c0_11], %11 {strides = array<i32>} : memref<8x768xf32, #tpu.memory_space<vmem>>, vector<8x768xf32>,
    } else {
    }
    %c0 = arith.constant 0 : index
    %c0_1 = arith.constant 0 : index
    %3 = vector.load %arg3[%c0, %c0_1] : memref<8x128xf32, #tpu.memory_space<vmem>>, vector<8x128xf32>
    %c0_2 = arith.constant 0 : index
    %c0_3 = arith.constant 0 : index
    %4 = vector.load %arg6[%c0_2, %c0_3] : memref<8x768xf32, #tpu.memory_space<vmem>>, vector<8x768xf32>
    %c0_4 = arith.constant 0 : index
    %c0_5 = arith.constant 0 : index
    %5 = vector.load %arg4[%c0_4, %c0_5] : memref<128x768xf32, #tpu.memory_space<vmem>>, vector<128x768xf32>
    %cst = arith.constant dense<0.000000e+00> : vector<8x768xf32>
    %6 = tpu.matmul %3, %5, %cst {dimension_numbers = #tpu.dot_dimension_numbers<[1], [0], [0], [1], [0, 0, 1, 1], [], []>} : vector<8x128xf32>, vector<128x768xf32>, vector<8x768xf32> -> vector<8x768xf32>
    %7 = arith.addf %4, %6 : vector<8x768xf32>
    %c0_6 = arith.constant 0 : index
    %c0_7 = arith.constant 0 : index
    %8 = vector.load %arg6[%c0_6, %c0_7] : memref<8x768xf32, #tpu.memory_space<vmem>>, vector<8x768xf32>
    tpu.vector_store %arg6[%c0_6, %c0_7], %7 {strides = array<i32>} : memref<8x768xf32, #tpu.memory_space<vmem>>, vector<8x768xf32>,
    return
  }
  func.func @transform_0(%arg0: i32, %arg1: i32, %arg2: i32) -> (i32, i32) {
    %c0_i32 = arith.constant 0 : i32
    return %arg0, %arg2 : i32, i32
  }
  func.func @transform_1(%arg0: i32, %arg1: i32, %arg2: i32) -> (i32, i32) {
    %c0_i32 = arith.constant 0 : i32
    return %arg2, %arg1 : i32, i32
  }
  func.func @transform_2(%arg0: i32, %arg1: i32, %arg2: i32) -> (i32, i32) {
    %c0_i32 = arith.constant 0 : i32
    %c0_i32_0 = arith.constant 0 : i32
    return %c0_i32, %arg1 : i32, i32
  }
  func.func @transform_3(%arg0: i32, %arg1: i32, %arg2: i32) -> (i32, i32) {
    %c0_i32 = arith.constant 0 : i32
    return %arg0, %arg1 : i32, i32
  }
}

module attributes {stable_mosaic.version = 11 : i64} {
  func.func @_linear_kernel_f32out(%arg0: i32, %arg1: i32, %arg2: i32, %arg3: memref<8x128xf32, #tpu.memory_space<vmem>>, %arg4: memref<128x768xf32, #tpu.memory_space<vmem>>, %arg5: memref<1x768xf32, #tpu.memory_space<vmem>>, %arg6: memref<8x768xf32, #tpu.memory_space<vmem>>) attributes {dimension_semantics = [#tpu.dimension_semantics<parallel>, #tpu.dimension_semantics<parallel>, #tpu.dimension_semantics<arbitrary>], iteration_bounds = array<i64: 1, 1, 1>, scalar_prefetch = 0 : i64, scratch_operands = 0 : i64, tpu.core_type = #tpu.core_type<tc>, window_params = [{transform_indices = @transform_0, window_bounds = array<i64: 8, 128>}, {transform_indices = @transform_1, window_bounds = array<i64: 128, 768>}, {transform_indices = @transform_2, window_bounds = array<i64: 1, 768>}, {transform_indices = @transform_3, window_bounds = array<i64: 8, 768>}]} {
    %c0_i32 = arith.constant 0 : i32
    %0 = arith.cmpi eq, %arg2, %c0_i32 : i32
    %1 = arith.extui %0 : i1 to i32
    %c0_i32_0 = arith.constant 0 : i32
    %2 = arith.cmpi ne, %1, %c0_i32_0 : i32
    scf.if %2 {
      %c0_8 = arith.constant 0 : index
      %c0_9 = arith.constant 0 : index
      %9 = vector.load %arg5[%c0_8, %c0_9] : memref<1x768xf32, #tpu.memory_space<vmem>>, vector<1x768xf32>
      %10 = vector.shape_cast %9 : vector<1x768xf32> to vector<1x768xf32>
      %11 = vector.broadcast %10 : vector<1x768xf32> to vector<8x768xf32>
      %c0_10 = arith.constant 0 : index
      %c0_11 = arith.constant 0 : index
      %12 = vector.load %arg6[%c0_10, %c0_11] : memref<8x768xf32, #tpu.memory_space<vmem>>, vector<8x768xf32>
      tpu.vector_store %arg6[%c0_10, %c0_11], %11 {strides = array<i32>} : memref<8x768xf32, #tpu.memory_space<vmem>>, vector<8x768xf32>,
    } else {
    }
    %c0 = arith.constant 0 : index
    %c0_1 = arith.constant 0 : index
    %3 = vector.load %arg3[%c0, %c0_1] : memref<8x128xf32, #tpu.memory_space<vmem>>, vector<8x128xf32>
    %c0_2 = arith.constant 0 : index
    %c0_3 = arith.constant 0 : index
    %4 = vector.load %arg6[%c0_2, %c0_3] : memref<8x768xf32, #tpu.memory_space<vmem>>, vector<8x768xf32>
    %c0_4 = arith.constant 0 : index
    %c0_5 = arith.constant 0 : index
    %5 = vector.load %arg4[%c0_4, %c0_5] : memref<128x768xf32, #tpu.memory_space<vmem>>, vector<128x768xf32>
    %cst = arith.constant dense<0.000000e+00> : vector<8x768xf32>
    %6 = tpu.matmul %3, %5, %cst {dimension_numbers = #tpu.dot_dimension_numbers<[1], [0], [0], [1], [0, 0, 1, 1], [], []>} : vector<8x128xf32>, vector<128x768xf32>, vector<8x768xf32> -> vector<8x768xf32>
    %7 = arith.addf %4, %6 : vector<8x768xf32>
    %c0_6 = arith.constant 0 : index
    %c0_7 = arith.constant 0 : index
    %8 = vector.load %arg6[%c0_6, %c0_7] : memref<8x768xf32, #tpu.memory_space<vmem>>, vector<8x768xf32>
    tpu.vector_store %arg6[%c0_6, %c0_7], %7 {strides = array<i32>} : memref<8x768xf32, #tpu.memory_space<vmem>>, vector<8x768xf32>,
    return
  }
  func.func @transform_0(%arg0: i32, %arg1: i32, %arg2: i32) -> (i32, i32) {
    %c0_i32 = arith.constant 0 : i32
    return %arg0, %arg2 : i32, i32
  }
  func.func @transform_1(%arg0: i32, %arg1: i32, %arg2: i32) -> (i32, i32) {
    %c0_i32 = arith.constant 0 : i32
    return %arg2, %arg1 : i32, i32
  }
  func.func @transform_2(%arg0: i32, %arg1: i32, %arg2: i32) -> (i32, i32) {
    %c0_i32 = arith.constant 0 : i32
    %c0_i32_0 = arith.constant 0 : i32
    return %c0_i32, %arg1 : i32, i32
  }
  func.func @transform_3(%arg0: i32, %arg1: i32, %arg2: i32) -> (i32, i32) {
    %c0_i32 = arith.constant 0 : i32
    return %arg0, %arg1 : i32, i32
  }
}

</mosaic_0001>

<bundles_post_ra>
// kernel: tpu_custom_call.1
= control target key start
LH: loop header
LB: loop body
LE: loop exit
PB: predicated region body
PF: predicated region fallthrough
CT: control target
= control target key end

     0   :  { %8 = vsyncpa [#allocation3], 0  ;;  %s481_s0 = inlined_call_operand.hbm [shape: f32[8,128], index: 0, kind: input, shape index: {}]   ;;  %s482_s1 = inlined_call_operand.hbm [shape: f32[128,768], index: 1, kind: input, shape index: {}]   ;;  %s483_s2 = inlined_call_operand.hbm [shape: f32[1,768], index: 2, kind: input, shape index: {}]   ;;  %s484_s3 = inlined_call_operand.hbm [shape: f32[8,768], index: 3, kind: output, shape index: {}]  }
   0x1   :  { %9 = vsyncpa [#allocation6], 0  ;;  %s26_s14 = sshll.u32 %s482_s1, 4  ;;  %s27_s14 = int_to_ptr.hbm [resolvable:$true] %s26_s14 }
   0x2   :  { %10 = vsyncpa [#allocation4], 0  ;;  %s443_s15 = smov [#allocation5]   ;;  %s16_s19 = sshll.u32 %s481_s0, 4  ;;  %s17_s19 = int_to_ptr.hbm [resolvable:$true] %s16_s19 }
   0x3   :  { %s28_s16 = sshll.u32 %s443_s15, 4  ;;  %s444_s20 = smov 768   ;;  %s29_s16 = int_to_ptr.vmem [resolvable:$true] %s28_s16 }
   0x4   :  { %s445_s21 = smov 48   ;;  %s446_s22 = smov [#allocation2]  }
   0x5   :  { %34 = dma.hbm_to_vmem [thread:$0]  %s27_s14, 12288, %s29_s16, [#allocation6], %s444_s20, %s444_s20, %s445_s21  }
   0x6   :  { %s18_s23 = sshll.u32 %s446_s22, 4  ;;  %s40_s26 = sshll.u32 %s483_s2, 4  ;;  %s19_s23 = int_to_ptr.vmem [resolvable:$true] %s18_s23  ;;  %s41_s26 = int_to_ptr.hbm [resolvable:$true] %s40_s26 }
   0x7   :  { %21 = dma.hbm_to_vmem [thread:$0]  %s17_s19, 128, %s19_s23, [#allocation3]  }
   0x8   :  { %s447_s1 = smov [#allocation7]  }
   0x9   :  { %s42_s27 = sshll.u32 %s447_s1, 4  ;;  %s43_s27 = int_to_ptr.vmem [resolvable:$true] %s42_s27 }
   0xa   :  { %45 = dma.hbm_to_vmem [thread:$0]  %s41_s26, 96, %s43_s27, [#allocation6]  }
   0xb   :  { %437 = dma.done.wait [#allocation3], 128  }
   0xc   :  { %438 = vsyncadd [#allocation3], 4294967168 }
   0xd   :  { %439 = dma.done.wait [#allocation6], 12384  }
   0xe   :  { %440 = vsyncadd [#allocation6], 4294954912  ;;  %v179_v0 = vld [vmem:[#allocation5 + $0x2d0] sm:$0xff]  ;;  %v180_v1 = vld [vmem:[#allocation5 + $0x2d8] sm:$0xff]  ;;  %s448_s0 = smov [#allocation8]   ;;  %s324_s30 = sshll.u32 %s484_s3, 4  ;;  %s325_s30 = int_to_ptr.hbm [resolvable:$true] %s324_s30 }
   0xf   :  { %v173_v2 = vld [vmem:[#allocation5 + $0x2a0] sm:$0xff]  ;;  %185 = vmatpush.msra.mxu0 %v179_v0  ;;  %205 = vmatpush.msra.mxu1 %v180_v1  ;;  %v174_v3 = vld [vmem:[#allocation5 + $0x2a8] sm:$0xff]  ;;  %v167_v4 = vld [vmem:[#allocation5 + $0x270] sm:$0xff]  ;;  %s322_s2 = sshll.u32 %s448_s0, 4  ;;  %s323_s2 = int_to_ptr.vmem [resolvable:$true] %s322_s2 }
  0x10   :  { %v168_v5 = vld [vmem:[#allocation5 + $0x278] sm:$0xff]  ;;  %v161_v6 = vld [vmem:[#allocation5 + $0x240] sm:$0xff]  ;;  %v162_v7 = vld [vmem:[#allocation5 + $0x248] sm:$0xff] }
  0x11   :  { %186 = vmatpush.msra.mxu0 %v173_v2  ;;  %206 = vmatpush.msra.mxu1 %v174_v3  ;;  %v155_v8 = vld [vmem:[#allocation5 + $0x210] sm:$0xff]  ;;  %v156_v9 = vld [vmem:[#allocation5 + $0x218] sm:$0xff]  ;;  %v149_v10 = vld [vmem:[#allocation5 + $0x1e0] sm:$0xff] }
  0x12   :  { %v150_v11 = vld [vmem:[#allocation5 + $0x1e8] sm:$0xff]  ;;  %v181_v12 = vld [vmem:[#allocation5 + $0x2e0] sm:$0xff]  ;;  %v143_v13 = vld [vmem:[#allocation5 + $0x1b0] sm:$0xff] }
  0x13   :  { %187 = vmatpush.msra.mxu0 %v167_v4  ;;  %207 = vmatpush.msra.mxu1 %v168_v5  ;;  %v182_v14 = vld [vmem:[#allocation5 + $0x2e8] sm:$0xff]  ;;  %v144_v15 = vld [vmem:[#allocation5 + $0x1b8] sm:$0xff]  ;;  %v175_v16 = vld [vmem:[#allocation5 + $0x2b0] sm:$0xff] }
  0x14   :  { %225 = vmatpush.msra.mxu2 %v181_v12  ;;  %245 = vmatpush.msra.mxu3 %v182_v14  ;;  %v176_v17 = vld [vmem:[#allocation5 + $0x2b8] sm:$0xff]  ;;  %v169_v18 = vld [vmem:[#allocation5 + $0x280] sm:$0xff]  ;;  %v170_v19 = vld [vmem:[#allocation5 + $0x288] sm:$0xff] }
  0x15   :  { %188 = vmatpush.msra.mxu0 %v161_v6  ;;  %208 = vmatpush.msra.mxu1 %v162_v7  ;;  %v137_v20 = vld [vmem:[#allocation5 + $0x180] sm:$0xff]  ;;  %v138_v21 = vld [vmem:[#allocation5 + $0x188] sm:$0xff]  ;;  %v163_v22 = vld [vmem:[#allocation5 + $0x250] sm:$0xff] }
  0x16   :  { %226 = vmatpush.msra.mxu2 %v175_v16  ;;  %246 = vmatpush.msra.mxu3 %v176_v17  ;;  %v164_v23 = vld [vmem:[#allocation5 + $0x258] sm:$0xff]  ;;  %v131_v24 = vld [vmem:[#allocation5 + $0x150] sm:$0xff]  ;;  %v157_v26 = vld [vmem:[#allocation5 + $0x220] sm:$0xff] }
  0x17   :  { %189 = vmatpush.msra.mxu0 %v155_v8  ;;  %209 = vmatpush.msra.mxu1 %v156_v9  ;;  %v132_v25 = vld [vmem:[#allocation5 + $0x158] sm:$0xff]  ;;  %v158_v27 = vld [vmem:[#allocation5 + $0x228] sm:$0xff]  ;;  %v125_v28 = vld [vmem:[#allocation5 + $0x120] sm:$0xff] }
  0x18   :  { %227 = vmatpush.msra.mxu2 %v169_v18  ;;  %247 = vmatpush.msra.mxu3 %v170_v19  ;;  %v126_v29 = vld [vmem:[#allocation5 + $0x128] sm:$0xff]  ;;  %v151_v30 = vld [vmem:[#allocation5 + $0x1f0] sm:$0xff]  ;;  %v152_v31 = vld [vmem:[#allocation5 + $0x1f8] sm:$0xff] }
  0x19   :  { %190 = vmatpush.msra.mxu0 %v149_v10  ;;  %210 = vmatpush.msra.mxu1 %v150_v11  ;;  %v119_v32 = vld [vmem:[#allocation5 + $0xf0] sm:$0xff]  ;;  %v120_v33 = vld [vmem:[#allocation5 + $0xf8] sm:$0xff]  ;;  %v145_v34 = vld [vmem:[#allocation5 + $0x1c0] sm:$0xff] }
  0x1a   :  { %228 = vmatpush.msra.mxu2 %v163_v22  ;;  %248 = vmatpush.msra.mxu3 %v164_v23  ;;  %v146_v35 = vld [vmem:[#allocation5 + $0x1c8] sm:$0xff]  ;;  %v113_v36 = vld [vmem:[#allocation5 + $0xc0] sm:$0xff]  ;;  %v139_v38 = vld [vmem:[#allocation5 + $0x190] sm:$0xff] }
  0x1b   :  { %191 = vmatpush.msra.mxu0 %v143_v13  ;;  %211 = vmatpush.msra.mxu1 %v144_v15  ;;  %v114_v37 = vld [vmem:[#allocation5 + $0xc8] sm:$0xff]  ;;  %v140_v39 = vld [vmem:[#allocation5 + $0x198] sm:$0xff]  ;;  %v107_v40 = vld [vmem:[#allocation5 + $0x90] sm:$0xff] }
  0x1c   :  { %229 = vmatpush.msra.mxu2 %v157_v26  ;;  %249 = vmatpush.msra.mxu3 %v158_v27  ;;  %v108_v41 = vld [vmem:[#allocation5 + $0x98] sm:$0xff]  ;;  %v133_v42 = vld [vmem:[#allocation5 + $0x160] sm:$0xff]  ;;  %v134_v43 = vld [vmem:[#allocation5 + $0x168] sm:$0xff] }
  0x1d   :  { %192 = vmatpush.msra.mxu0 %v137_v20  ;;  %212 = vmatpush.msra.mxu1 %v138_v21  ;;  %v101_v44 = vld [vmem:[#allocation5 + $0x60] sm:$0xff]  ;;  %v102_v45 = vld [vmem:[#allocation5 + $0x68] sm:$0xff]  ;;  %v127_v46 = vld [vmem:[#allocation5 + $0x130] sm:$0xff] }
  0x1e   :  { %230 = vmatpush.msra.mxu2 %v151_v30  ;;  %250 = vmatpush.msra.mxu3 %v152_v31  ;;  %v128_v47 = vld [vmem:[#allocation5 + $0x138] sm:$0xff]  ;;  %v95_v48 = vld [vmem:[#allocation5 + $0x30] sm:$0xff]  ;;  %v121_v50 = vld [vmem:[#allocation5 + $0x100] sm:$0xff] }
  0x1f   :  { %193 = vmatpush.msra.mxu0 %v131_v24  ;;  %213 = vmatpush.msra.mxu1 %v132_v25  ;;  %v96_v49 = vld [vmem:[#allocation5 + $0x38] sm:$0xff]  ;;  %v122_v51 = vld [vmem:[#allocation5 + $0x108] sm:$0xff]  ;;  %v89_v52 = vld [vmem:[#allocation5] sm:$0xff] }
  0x20   :  { %231 = vmatpush.msra.mxu2 %v145_v34  ;;  %251 = vmatpush.msra.mxu3 %v146_v35  ;;  %v90_v53 = vld [vmem:[#allocation5 + $0x8] sm:$0xff]  ;;  %v183_v54 = vld [vmem:[#allocation5 + $0x2f0] sm:$0xff]  ;;  %v184_v55 = vld [vmem:[#allocation5 + $0x2f8] sm:$0xff] }
  0x21   :  { %194 = vmatpush.msra.mxu0 %v125_v28  ;;  %214 = vmatpush.msra.mxu1 %v126_v29  ;;  %v115_v56 = vld [vmem:[#allocation5 + $0xd0] sm:$0xff]  ;;  %v116_v57 = vld [vmem:[#allocation5 + $0xd8] sm:$0xff]  ;;  %v177_v58 = vld [vmem:[#allocation5 + $0x2c0] sm:$0xff] }
  0x22   :  { %232 = vmatpush.msra.mxu2 %v139_v38  ;;  %252 = vmatpush.msra.mxu3 %v140_v39  ;;  %v178_v59 = vld [vmem:[#allocation5 + $0x2c8] sm:$0xff]  ;;  %v109_v60 = vld [vmem:[#allocation5 + $0xa0] sm:$0xff]  ;;  %v171_v62 = vld [vmem:[#allocation5 + $0x290] sm:$0xff] }
  0x23   :  { %195 = vmatpush.msra.mxu0 %v119_v32  ;;  %215 = vmatpush.msra.mxu1 %v120_v33  ;;  %v110_v61 = vld [vmem:[#allocation5 + $0xa8] sm:$0xff]  ;;  %v172_v63 = vld [vmem:[#allocation5 + $0x298] sm:$0xff]  ;;  %v103_v0 = vld [vmem:[#allocation5 + $0x70] sm:$0xff] }
  0x24   :  { %233 = vmatpush.msra.mxu2 %v133_v42  ;;  %253 = vmatpush.msra.mxu3 %v134_v43  ;;  %v104_v1 = vld [vmem:[#allocation5 + $0x78] sm:$0xff]  ;;  %v165_v2 = vld [vmem:[#allocation5 + $0x260] sm:$0xff]  ;;  %v166_v3 = vld [vmem:[#allocation5 + $0x268] sm:$0xff] }
  0x25   :  { %196 = vmatpush.msra.mxu0 %v113_v36  ;;  %216 = vmatpush.msra.mxu1 %v114_v37  ;;  %v97_v4 = vld [vmem:[#allocation5 + $0x40] sm:$0xff]  ;;  %v98_v5 = vld [vmem:[#allocation5 + $0x48] sm:$0xff]  ;;  %v159_v6 = vld [vmem:[#allocation5 + $0x230] sm:$0xff] }
  0x26   :  { %234 = vmatpush.msra.mxu2 %v127_v46  ;;  %254 = vmatpush.msra.mxu3 %v128_v47  ;;  %v160_v7 = vld [vmem:[#allocation5 + $0x238] sm:$0xff]  ;;  %v153_v9 = vld [vmem:[#allocation5 + $0x200] sm:$0xff]  ;;  %v154_v10 = vld [vmem:[#allocation5 + $0x208] sm:$0xff] }
  0x27   :  { %197 = vmatpush.msra.mxu0 %v107_v40  ;;  %217 = vmatpush.msra.mxu1 %v108_v41  ;;  %v82_v8 = vld [vmem:[#allocation2] sm:$0xff]  ;;  %v91_v11 = vld [vmem:[#allocation5 + $0x10] sm:$0xff]  ;;  %v141_v15 = vld [vmem:[#allocation5 + $0x1a0] sm:$0xff] }
  0x28   :  { %235 = vmatpush.msra.mxu2 %v121_v50  ;;  %255 = vmatpush.msra.mxu3 %v122_v51  ;;  %v92_v12 = vld [vmem:[#allocation5 + $0x18] sm:$0xff]  ;;  %v147_v13 = vld [vmem:[#allocation5 + $0x1d0] sm:$0xff]  ;;  %v142_v16 = vld [vmem:[#allocation5 + $0x1a8] sm:$0xff] }
  0x29   :  { %198 = vmatpush.msra.mxu0 %v101_v44  ;;  %218 = vmatpush.msra.mxu1 %v102_v45  ;;  %v148_v14 = vld [vmem:[#allocation5 + $0x1d8] sm:$0xff]  ;;  %v135_v17 = vld [vmem:[#allocation5 + $0x170] sm:$0xff]  ;;  %v129_v19 = vld [vmem:[#allocation5 + $0x140] sm:$0xff] }
  0x2a   :  { %236 = vmatpush.msra.mxu2 %v115_v56  ;;  %256 = vmatpush.msra.mxu3 %v116_v57  ;;  %v136_v18 = vld [vmem:[#allocation5 + $0x178] sm:$0xff]  ;;  %v130_v20 = vld [vmem:[#allocation5 + $0x148] sm:$0xff]  ;;  %v123_v21 = vld [vmem:[#allocation5 + $0x110] sm:$0xff] }
  0x2b   :  { %199 = vmatpush.msra.mxu0 %v95_v48  ;;  %219 = vmatpush.msra.mxu1 %v96_v49  ;;  %v124_v22 = vld [vmem:[#allocation5 + $0x118] sm:$0xff]  ;;  %v117_v23 = vld [vmem:[#allocation5 + $0xe0] sm:$0xff]  ;;  %v118_v24 = vld [vmem:[#allocation5 + $0xe8] sm:$0xff] }
  0x2c   :  { %237 = vmatpush.msra.mxu2 %v109_v60  ;;  %257 = vmatpush.msra.mxu3 %v110_v61  ;;  %v111_v25 = vld [vmem:[#allocation5 + $0xb0] sm:$0xff]  ;;  %v112_v26 = vld [vmem:[#allocation5 + $0xb8] sm:$0xff]  ;;  %v105_v27 = vld [vmem:[#allocation5 + $0x80] sm:$0xff] }
  0x2d   :  { %200 = vmatpush.msra.mxu0 %v89_v52  ;;  %220 = vmatpush.msra.mxu1 %v90_v53  ;;  %v106_v28 = vld [vmem:[#allocation5 + $0x88] sm:$0xff]  ;;  %v99_v29 = vld [vmem:[#allocation5 + $0x50] sm:$0xff]  ;;  %v100_v30 = vld [vmem:[#allocation5 + $0x58] sm:$0xff] }
  0x2e   :  { %238 = vmatpush.msra.mxu2 %v103_v0  ;;  %258 = vmatpush.msra.mxu3 %v104_v1  ;;  %v93_v31 = vld [vmem:[#allocation5 + $0x20] sm:$0xff]  ;;  %v94_v32 = vld [vmem:[#allocation5 + $0x28] sm:$0xff] }
  0x2f   :  { %265 = vmatpush.msrb.mxu0 %v183_v54  ;;  %285 = vmatpush.msrb.mxu1 %v184_v55  ;;  %v62_v33 = vld [vmem:[#allocation7] sm:$0x3f] }
  0x30   :  { %239 = vmatpush.msra.mxu2 %v97_v4  ;;  %259 = vmatpush.msra.mxu3 %v98_v5  ;;  %v64_v34 = vperm.slane %v62_v33, 0  ;;  %v65_v35 = vperm.slane %v62_v33, 1  ;;  %v66_v40 = vperm.slane %v62_v33, 2  ;;  %v67_v41 = vperm.slane %v62_v33, 3 }
  0x31   :  { %266 = vmatpush.msrb.mxu0 %v177_v58  ;;  %286 = vmatpush.msrb.mxu1 %v178_v59  ;;  %v68_v46 = vperm.slane %v62_v33, 4  ;;  %v69_v47 = vperm.slane %v62_v33, 5 }
  0x32   :  { %201 = vmatmul.f32.vlgmr.msra.gmra.mxu0 %v82_v8  ;;  %221 = vmatmul.f32.vlgmr.msra.gmra.mxu1 %v82_v8 }
  0x33   :  { %267 = vmatpush.msrb.mxu0 %v171_v62  ;;  %287 = vmatpush.msrb.mxu1 %v172_v63 }
  0x34   :  { %240 = vmatpush.msra.mxu2 %v91_v11  ;;  %260 = vmatpush.msra.mxu3 %v92_v12 }
  0x35   :  { %268 = vmatpush.msrb.mxu0 %v165_v2  ;;  %288 = vmatpush.msrb.mxu1 %v166_v3 }
  0x36   :  { %241 = vmatmul.f32.vlgmr.msra.gmra.mxu2 %v82_v8  ;;  %261 = vmatmul.f32.vlgmr.msra.gmra.mxu3 %v82_v8 }
  0x37   :  { %269 = vmatpush.msrb.mxu0 %v159_v6  ;;  %289 = vmatpush.msrb.mxu1 %v160_v7 }
  0x39   :  { %270 = vmatpush.msrb.mxu0 %v153_v9  ;;  %290 = vmatpush.msrb.mxu1 %v154_v10 }
  0x3b   :  { %271 = vmatpush.msrb.mxu0 %v147_v13  ;;  %291 = vmatpush.msrb.mxu1 %v148_v14 }
  0x3d   :  { %272 = vmatpush.msrb.mxu0 %v141_v15  ;;  %292 = vmatpush.msrb.mxu1 %v142_v16 }
  0x3f   :  { %273 = vmatpush.msrb.mxu0 %v135_v17  ;;  %293 = vmatpush.msrb.mxu1 %v136_v18 }
  0x41   :  { %274 = vmatpush.msrb.mxu0 %v129_v19  ;;  %294 = vmatpush.msrb.mxu1 %v130_v20 }
  0x43   :  { %275 = vmatpush.msrb.mxu0 %v123_v21  ;;  %295 = vmatpush.msrb.mxu1 %v124_v22 }
  0x45   :  { %276 = vmatpush.msrb.mxu0 %v117_v23  ;;  %296 = vmatpush.msrb.mxu1 %v118_v24 }
  0x47   :  { %277 = vmatpush.msrb.mxu0 %v111_v25  ;;  %297 = vmatpush.msrb.mxu1 %v112_v26 }
  0x49   :  { %278 = vmatpush.msrb.mxu0 %v105_v27  ;;  %298 = vmatpush.msrb.mxu1 %v106_v28 }
  0x4b   :  { %279 = vmatpush.msrb.mxu0 %v99_v29  ;;  %299 = vmatpush.msrb.mxu1 %v100_v30 }
  0x4d   :  { %280 = vmatpush.msrb.mxu0 %v93_v31  ;;  %300 = vmatpush.msrb.mxu1 %v94_v32 }
  0x4e   :  { %281 = vmatmul.f32.vlgmr.msrb.gmra.mxu0 %v82_v8  ;;  %301 = vmatmul.f32.vlgmr.msrb.gmra.mxu1 %v82_v8 }
  0xaf   :  { %v202_v36 = vpop.f32.mrf.mxu0  ;;  %v222_v37 = vpop.f32.mrf.mxu1 }
  0xb0   :  { %v305_v38 = vadd.f32 %v202_v36, %v64_v34  ;;  %v306_v39 = vadd.f32 %v222_v37, %v65_v35 }
  0xb2   :  { %311 = vst [vmem:[#allocation8] sm:$0xff] %v305_v38 }
  0xb3   :  { %312 = vst [vmem:[#allocation8 + $0x8] sm:$0xff] %v306_v39 }
  0xb9   :  { %v242_v42 = vpop.f32.mrf.mxu2  ;;  %v262_v43 = vpop.f32.mrf.mxu3 }
  0xba   :  { %v307_v44 = vadd.f32 %v242_v42, %v66_v40  ;;  %v308_v45 = vadd.f32 %v262_v43, %v67_v41 }
  0xbc   :  { %313 = vst [vmem:[#allocation8 + $0x10] sm:$0xff] %v307_v44 }
  0xbd   :  { %314 = vst [vmem:[#allocation8 + $0x18] sm:$0xff] %v308_v45 }
  0xcb   :  { %v282_v48 = vpop.f32.mrf.mxu0  ;;  %v302_v49 = vpop.f32.mrf.mxu1 }
  0xcc   :  { %v309_v50 = vadd.f32 %v282_v48, %v68_v46  ;;  %v310_v51 = vadd.f32 %v302_v49, %v69_v47 }
  0xce   :  { %315 = vst [vmem:[#allocation8 + $0x20] sm:$0xff] %v309_v50 }
  0xcf   :  { %316 = vst [vmem:[#allocation8 + $0x28] sm:$0xff] %v310_v51 }
  0xd0   :  { %327 = dma.vmem_to_hbm [thread:$0]  %s323_s2, 768, %s325_s30, [#allocation4]  }
  0xd1   :  { %441 = dma.done.wait [#allocation4], 768  }
  0xd2   :  { %442 = vsyncadd [#allocation4], 4294966528 }
  0xd3   :  { %332 = vsyncpa [#allocation3], 1 }
  0xd4   :  { %333 = vsyncpa [#allocation6], 1 }
  0xd5   :  { %334 = vsyncpa [#allocation4], 1 }

// kernel: tpu_custom_call.1
= control target key start
LH: loop header
LB: loop body
LE: loop exit
PB: predicated region body
PF: predicated region fallthrough
CT: control target
= control target key end

     0   :  { %8 = vsyncpa [#allocation3], 0  ;;  %s481_s0 = inlined_call_operand.hbm [shape: f32[8,128], index: 0, kind: input, shape index: {}]   ;;  %s482_s1 = inlined_call_operand.hbm [shape: f32[128,768], index: 1, kind: input, shape index: {}]   ;;  %s483_s2 = inlined_call_operand.hbm [shape: f32[1,768], index: 2, kind: input, shape index: {}]   ;;  %s484_s3 = inlined_call_operand.hbm [shape: f32[8,768], index: 3, kind: output, shape index: {}]  }
   0x1   :  { %9 = vsyncpa [#allocation6], 0  ;;  %s26_s14 = sshll.u32 %s482_s1, 4  ;;  %s27_s14 = int_to_ptr.hbm [resolvable:$true] %s26_s14 }
   0x2   :  { %10 = vsyncpa [#allocation4], 0  ;;  %s443_s15 = smov [#allocation5]   ;;  %s16_s19 = sshll.u32 %s481_s0, 4  ;;  %s17_s19 = int_to_ptr.hbm [resolvable:$true] %s16_s19 }
   0x3   :  { %s28_s16 = sshll.u32 %s443_s15, 4  ;;  %s444_s20 = smov 768   ;;  %s29_s16 = int_to_ptr.vmem [resolvable:$true] %s28_s16 }
   0x4   :  { %s445_s21 = smov 48   ;;  %s446_s22 = smov [#allocation2]  }
   0x5   :  { %34 = dma.hbm_to_vmem [thread:$0]  %s27_s14, 12288, %s29_s16, [#allocation6], %s444_s20, %s444_s20, %s445_s21  }
   0x6   :  { %s18_s23 = sshll.u32 %s446_s22, 4  ;;  %s40_s26 = sshll.u32 %s483_s2, 4  ;;  %s19_s23 = int_to_ptr.vmem [resolvable:$true] %s18_s23  ;;  %s41_s26 = int_to_ptr.hbm [resolvable:$true] %s40_s26 }
   0x7   :  { %21 = dma.hbm_to_vmem [thread:$0]  %s17_s19, 128, %s19_s23, [#allocation3]  }
   0x8   :  { %s447_s1 = smov [#allocation7]  }
   0x9   :  { %s42_s27 = sshll.u32 %s447_s1, 4  ;;  %s43_s27 = int_to_ptr.vmem [resolvable:$true] %s42_s27 }
   0xa   :  { %45 = dma.hbm_to_vmem [thread:$0]  %s41_s26, 96, %s43_s27, [#allocation6]  }
   0xb   :  { %437 = dma.done.wait [#allocation3], 128  }
   0xc   :  { %438 = vsyncadd [#allocation3], 4294967168 }
   0xd   :  { %439 = dma.done.wait [#allocation6], 12384  }
   0xe   :  { %440 = vsyncadd [#allocation6], 4294954912  ;;  %v179_v0 = vld [vmem:[#allocation5 + $0x2d0] sm:$0xff]  ;;  %v180_v1 = vld [vmem:[#allocation5 + $0x2d8] sm:$0xff]  ;;  %s448_s0 = smov [#allocation8]   ;;  %s324_s30 = sshll.u32 %s484_s3, 4  ;;  %s325_s30 = int_to_ptr.hbm [resolvable:$true] %s324_s30 }
   0xf   :  { %v173_v2 = vld [vmem:[#allocation5 + $0x2a0] sm:$0xff]  ;;  %185 = vmatpush.msra.mxu0 %v179_v0  ;;  %205 = vmatpush.msra.mxu1 %v180_v1  ;;  %v174_v3 = vld [vmem:[#allocation5 + $0x2a8] sm:$0xff]  ;;  %v167_v4 = vld [vmem:[#allocation5 + $0x270] sm:$0xff]  ;;  %s322_s2 = sshll.u32 %s448_s0, 4  ;;  %s323_s2 = int_to_ptr.vmem [resolvable:$true] %s322_s2 }
  0x10   :  { %v168_v5 = vld [vmem:[#allocation5 + $0x278] sm:$0xff]  ;;  %v161_v6 = vld [vmem:[#allocation5 + $0x240] sm:$0xff]  ;;  %v162_v7 = vld [vmem:[#allocation5 + $0x248] sm:$0xff] }
  0x11   :  { %186 = vmatpush.msra.mxu0 %v173_v2  ;;  %206 = vmatpush.msra.mxu1 %v174_v3  ;;  %v155_v8 = vld [vmem:[#allocation5 + $0x210] sm:$0xff]  ;;  %v156_v9 = vld [vmem:[#allocation5 + $0x218] sm:$0xff]  ;;  %v149_v10 = vld [vmem:[#allocation5 + $0x1e0] sm:$0xff] }
  0x12   :  { %v150_v11 = vld [vmem:[#allocation5 + $0x1e8] sm:$0xff]  ;;  %v181_v12 = vld [vmem:[#allocation5 + $0x2e0] sm:$0xff]  ;;  %v143_v13 = vld [vmem:[#allocation5 + $0x1b0] sm:$0xff] }
  0x13   :  { %187 = vmatpush.msra.mxu0 %v167_v4  ;;  %207 = vmatpush.msra.mxu1 %v168_v5  ;;  %v182_v14 = vld [vmem:[#allocation5 + $0x2e8] sm:$0xff]  ;;  %v144_v15 = vld [vmem:[#allocation5 + $0x1b8] sm:$0xff]  ;;  %v175_v16 = vld [vmem:[#allocation5 + $0x2b0] sm:$0xff] }
  0x14   :  { %225 = vmatpush.msra.mxu2 %v181_v12  ;;  %245 = vmatpush.msra.mxu3 %v182_v14  ;;  %v176_v17 = vld [vmem:[#allocation5 + $0x2b8] sm:$0xff]  ;;  %v169_v18 = vld [vmem:[#allocation5 + $0x280] sm:$0xff]  ;;  %v170_v19 = vld [vmem:[#allocation5 + $0x288] sm:$0xff] }
  0x15   :  { %188 = vmatpush.msra.mxu0 %v161_v6  ;;  %208 = vmatpush.msra.mxu1 %v162_v7  ;;  %v137_v20 = vld [vmem:[#allocation5 + $0x180] sm:$0xff]  ;;  %v138_v21 = vld [vmem:[#allocation5 + $0x188] sm:$0xff]  ;;  %v163_v22 = vld [vmem:[#allocation5 + $0x250] sm:$0xff] }
  0x16   :  { %226 = vmatpush.msra.mxu2 %v175_v16  ;;  %246 = vmatpush.msra.mxu3 %v176_v17  ;;  %v164_v23 = vld [vmem:[#allocation5 + $0x258] sm:$0xff]  ;;  %v131_v24 = vld [vmem:[#allocation5 + $0x150] sm:$0xff]  ;;  %v157_v26 = vld [vmem:[#allocation5 + $0x220] sm:$0xff] }
  0x17   :  { %189 = vmatpush.msra.mxu0 %v155_v8  ;;  %209 = vmatpush.msra.mxu1 %v156_v9  ;;  %v132_v25 = vld [vmem:[#allocation5 + $0x158] sm:$0xff]  ;;  %v158_v27 = vld [vmem:[#allocation5 + $0x228] sm:$0xff]  ;;  %v125_v28 = vld [vmem:[#allocation5 + $0x120] sm:$0xff] }
  0x18   :  { %227 = vmatpush.msra.mxu2 %v169_v18  ;;  %247 = vmatpush.msra.mxu3 %v170_v19  ;;  %v126_v29 = vld [vmem:[#allocation5 + $0x128] sm:$0xff]  ;;  %v151_v30 = vld [vmem:[#allocation5 + $0x1f0] sm:$0xff]  ;;  %v152_v31 = vld [vmem:[#allocation5 + $0x1f8] sm:$0xff] }
  0x19   :  { %190 = vmatpush.msra.mxu0 %v149_v10  ;;  %210 = vmatpush.msra.mxu1 %v150_v11  ;;  %v119_v32 = vld [vmem:[#allocation5 + $0xf0] sm:$0xff]  ;;  %v120_v33 = vld [vmem:[#allocation5 + $0xf8] sm:$0xff]  ;;  %v145_v34 = vld [vmem:[#allocation5 + $0x1c0] sm:$0xff] }
  0x1a   :  { %228 = vmatpush.msra.mxu2 %v163_v22  ;;  %248 = vmatpush.msra.mxu3 %v164_v23  ;;  %v146_v35 = vld [vmem:[#allocation5 + $0x1c8] sm:$0xff]  ;;  %v113_v36 = vld [vmem:[#allocation5 + $0xc0] sm:$0xff]  ;;  %v139_v38 = vld [vmem:[#allocation5 + $0x190] sm:$0xff] }
  0x1b   :  { %191 = vmatpush.msra.mxu0 %v143_v13  ;;  %211 = vmatpush.msra.mxu1 %v144_v15  ;;  %v114_v37 = vld [vmem:[#allocation5 + $0xc8] sm:$0xff]  ;;  %v140_v39 = vld [vmem:[#allocation5 + $0x198] sm:$0xff]  ;;  %v107_v40 = vld [vmem:[#allocation5 + $0x90] sm:$0xff] }
  0x1c   :  { %229 = vmatpush.msra.mxu2 %v157_v26  ;;  %249 = vmatpush.msra.mxu3 %v158_v27  ;;  %v108_v41 = vld [vmem:[#allocation5 + $0x98] sm:$0xff]  ;;  %v133_v42 = vld [vmem:[#allocation5 + $0x160] sm:$0xff]  ;;  %v134_v43 = vld [vmem:[#allocation5 + $0x168] sm:$0xff] }
  0x1d   :  { %192 = vmatpush.msra.mxu0 %v137_v20  ;;  %212 = vmatpush.msra.mxu1 %v138_v21  ;;  %v101_v44 = vld [vmem:[#allocation5 + $0x60] sm:$0xff]  ;;  %v102_v45 = vld [vmem:[#allocation5 + $0x68] sm:$0xff]  ;;  %v127_v46 = vld [vmem:[#allocation5 + $0x130] sm:$0xff] }
  0x1e   :  { %230 = vmatpush.msra.mxu2 %v151_v30  ;;  %250 = vmatpush.msra.mxu3 %v152_v31  ;;  %v128_v47 = vld [vmem:[#allocation5 + $0x138] sm:$0xff]  ;;  %v95_v48 = vld [vmem:[#allocation5 + $0x30] sm:$0xff]  ;;  %v121_v50 = vld [vmem:[#allocation5 + $0x100] sm:$0xff] }
  0x1f   :  { %193 = vmatpush.msra.mxu0 %v131_v24  ;;  %213 = vmatpush.msra.mxu1 %v132_v25  ;;  %v96_v49 = vld [vmem:[#allocation5 + $0x38] sm:$0xff]  ;;  %v122_v51 = vld [vmem:[#allocation5 + $0x108] sm:$0xff]  ;;  %v89_v52 = vld [vmem:[#allocation5] sm:$0xff] }
  0x20   :  { %231 = vmatpush.msra.mxu2 %v145_v34  ;;  %251 = vmatpush.msra.mxu3 %v146_v35  ;;  %v90_v53 = vld [vmem:[#allocation5 + $0x8] sm:$0xff]  ;;  %v183_v54 = vld [vmem:[#allocation5 + $0x2f0] sm:$0xff]  ;;  %v184_v55 = vld [vmem:[#allocation5 + $0x2f8] sm:$0xff] }
  0x21   :  { %194 = vmatpush.msra.mxu0 %v125_v28  ;;  %214 = vmatpush.msra.mxu1 %v126_v29  ;;  %v115_v56 = vld [vmem:[#allocation5 + $0xd0] sm:$0xff]  ;;  %v116_v57 = vld [vmem:[#allocation5 + $0xd8] sm:$0xff]  ;;  %v177_v58 = vld [vmem:[#allocation5 + $0x2c0] sm:$0xff] }
  0x22   :  { %232 = vmatpush.msra.mxu2 %v139_v38  ;;  %252 = vmatpush.msra.mxu3 %v140_v39  ;;  %v178_v59 = vld [vmem:[#allocation5 + $0x2c8] sm:$0xff]  ;;  %v109_v60 = vld [vmem:[#allocation5 + $0xa0] sm:$0xff]  ;;  %v171_v62 = vld [vmem:[#allocation5 + $0x290] sm:$0xff] }
  0x23   :  { %195 = vmatpush.msra.mxu0 %v119_v32  ;;  %215 = vmatpush.msra.mxu1 %v120_v33  ;;  %v110_v61 = vld [vmem:[#allocation5 + $0xa8] sm:$0xff]  ;;  %v172_v63 = vld [vmem:[#allocation5 + $0x298] sm:$0xff]  ;;  %v103_v0 = vld [vmem:[#allocation5 + $0x70] sm:$0xff] }
  0x24   :  { %233 = vmatpush.msra.mxu2 %v133_v42  ;;  %253 = vmatpush.msra.mxu3 %v134_v43  ;;  %v104_v1 = vld [vmem:[#allocation5 + $0x78] sm:$0xff]  ;;  %v165_v2 = vld [vmem:[#allocation5 + $0x260] sm:$0xff]  ;;  %v166_v3 = vld [vmem:[#allocation5 + $0x268] sm:$0xff] }
  0x25   :  { %196 = vmatpush.msra.mxu0 %v113_v36  ;;  %216 = vmatpush.msra.mxu1 %v114_v37  ;;  %v97_v4 = vld [vmem:[#allocation5 + $0x40] sm:$0xff]  ;;  %v98_v5 = vld [vmem:[#allocation5 + $0x48] sm:$0xff]  ;;  %v159_v6 = vld [vmem:[#allocation5 + $0x230] sm:$0xff] }
  0x26   :  { %234 = vmatpush.msra.mxu2 %v127_v46  ;;  %254 = vmatpush.msra.mxu3 %v128_v47  ;;  %v160_v7 = vld [vmem:[#allocation5 + $0x238] sm:$0xff]  ;;  %v153_v9 = vld [vmem:[#allocation5 + $0x200] sm:$0xff]  ;;  %v154_v10 = vld [vmem:[#allocation5 + $0x208] sm:$0xff] }
  0x27   :  { %197 = vmatpush.msra.mxu0 %v107_v40  ;;  %217 = vmatpush.msra.mxu1 %v108_v41  ;;  %v82_v8 = vld [vmem:[#allocation2] sm:$0xff]  ;;  %v91_v11 = vld [vmem:[#allocation5 + $0x10] sm:$0xff]  ;;  %v141_v15 = vld [vmem:[#allocation5 + $0x1a0] sm:$0xff] }
  0x28   :  { %235 = vmatpush.msra.mxu2 %v121_v50  ;;  %255 = vmatpush.msra.mxu3 %v122_v51  ;;  %v92_v12 = vld [vmem:[#allocation5 + $0x18] sm:$0xff]  ;;  %v147_v13 = vld [vmem:[#allocation5 + $0x1d0] sm:$0xff]  ;;  %v142_v16 = vld [vmem:[#allocation5 + $0x1a8] sm:$0xff] }
  0x29   :  { %198 = vmatpush.msra.mxu0 %v101_v44  ;;  %218 = vmatpush.msra.mxu1 %v102_v45  ;;  %v148_v14 = vld [vmem:[#allocation5 + $0x1d8] sm:$0xff]  ;;  %v135_v17 = vld [vmem:[#allocation5 + $0x170] sm:$0xff]  ;;  %v129_v19 = vld [vmem:[#allocation5 + $0x140] sm:$0xff] }
  0x2a   :  { %236 = vmatpush.msra.mxu2 %v115_v56  ;;  %256 = vmatpush.msra.mxu3 %v116_v57  ;;  %v136_v18 = vld [vmem:[#allocation5 + $0x178] sm:$0xff]  ;;  %v130_v20 = vld [vmem:[#allocation5 + $0x148] sm:$0xff]  ;;  %v123_v21 = vld [vmem:[#allocation5 + $0x110] sm:$0xff] }
  0x2b   :  { %199 = vmatpush.msra.mxu0 %v95_v48  ;;  %219 = vmatpush.msra.mxu1 %v96_v49  ;;  %v124_v22 = vld [vmem:[#allocation5 + $0x118] sm:$0xff]  ;;  %v117_v23 = vld [vmem:[#allocation5 + $0xe0] sm:$0xff]  ;;  %v118_v24 = vld [vmem:[#allocation5 + $0xe8] sm:$0xff] }
  0x2c   :  { %237 = vmatpush.msra.mxu2 %v109_v60  ;;  %257 = vmatpush.msra.mxu3 %v110_v61  ;;  %v111_v25 = vld [vmem:[#allocation5 + $0xb0] sm:$0xff]  ;;  %v112_v26 = vld [vmem:[#allocation5 + $0xb8] sm:$0xff]  ;;  %v105_v27 = vld [vmem:[#allocation5 + $0x80] sm:$0xff] }
  0x2d   :  { %200 = vmatpush.msra.mxu0 %v89_v52  ;;  %220 = vmatpush.msra.mxu1 %v90_v53  ;;  %v106_v28 = vld [vmem:[#allocation5 + $0x88] sm:$0xff]  ;;  %v99_v29 = vld [vmem:[#allocation5 + $0x50] sm:$0xff]  ;;  %v100_v30 = vld [vmem:[#allocation5 + $0x58] sm:$0xff] }
  0x2e   :  { %238 = vmatpush.msra.mxu2 %v103_v0  ;;  %258 = vmatpush.msra.mxu3 %v104_v1  ;;  %v93_v31 = vld [vmem:[#allocation5 + $0x20] sm:$0xff]  ;;  %v94_v32 = vld [vmem:[#allocation5 + $0x28] sm:$0xff] }
  0x2f   :  { %265 = vmatpush.msrb.mxu0 %v183_v54  ;;  %285 = vmatpush.msrb.mxu1 %v184_v55  ;;  %v62_v33 = vld [vmem:[#allocation7] sm:$0x3f] }
  0x30   :  { %239 = vmatpush.msra.mxu2 %v97_v4  ;;  %259 = vmatpush.msra.mxu3 %v98_v5  ;;  %v64_v34 = vperm.slane %v62_v33, 0  ;;  %v65_v35 = vperm.slane %v62_v33, 1  ;;  %v66_v40 = vperm.slane %v62_v33, 2  ;;  %v67_v41 = vperm.slane %v62_v33, 3 }
  0x31   :  { %266 = vmatpush.msrb.mxu0 %v177_v58  ;;  %286 = vmatpush.msrb.mxu1 %v178_v59  ;;  %v68_v46 = vperm.slane %v62_v33, 4  ;;  %v69_v47 = vperm.slane %v62_v33, 5 }
  0x32   :  { %201 = vmatmul.f32.vlgmr.msra.gmra.mxu0 %v82_v8  ;;  %221 = vmatmul.f32.vlgmr.msra.gmra.mxu1 %v82_v8 }
  0x33   :  { %267 = vmatpush.msrb.mxu0 %v171_v62  ;;  %287 = vmatpush.msrb.mxu1 %v172_v63 }
  0x34   :  { %240 = vmatpush.msra.mxu2 %v91_v11  ;;  %260 = vmatpush.msra.mxu3 %v92_v12 }
  0x35   :  { %268 = vmatpush.msrb.mxu0 %v165_v2  ;;  %288 = vmatpush.msrb.mxu1 %v166_v3 }
  0x36   :  { %241 = vmatmul.f32.vlgmr.msra.gmra.mxu2 %v82_v8  ;;  %261 = vmatmul.f32.vlgmr.msra.gmra.mxu3 %v82_v8 }
  0x37   :  { %269 = vmatpush.msrb.mxu0 %v159_v6  ;;  %289 = vmatpush.msrb.mxu1 %v160_v7 }
  0x39   :  { %270 = vmatpush.msrb.mxu0 %v153_v9  ;;  %290 = vmatpush.msrb.mxu1 %v154_v10 }
  0x3b   :  { %271 = vmatpush.msrb.mxu0 %v147_v13  ;;  %291 = vmatpush.msrb.mxu1 %v148_v14 }
  0x3d   :  { %272 = vmatpush.msrb.mxu0 %v141_v15  ;;  %292 = vmatpush.msrb.mxu1 %v142_v16 }
  0x3f   :  { %273 = vmatpush.msrb.mxu0 %v135_v17  ;;  %293 = vmatpush.msrb.mxu1 %v136_v18 }
  0x41   :  { %274 = vmatpush.msrb.mxu0 %v129_v19  ;;  %294 = vmatpush.msrb.mxu1 %v130_v20 }
  0x43   :  { %275 = vmatpush.msrb.mxu0 %v123_v21  ;;  %295 = vmatpush.msrb.mxu1 %v124_v22 }
  0x45   :  { %276 = vmatpush.msrb.mxu0 %v117_v23  ;;  %296 = vmatpush.msrb.mxu1 %v118_v24 }
  0x47   :  { %277 = vmatpush.msrb.mxu0 %v111_v25  ;;  %297 = vmatpush.msrb.mxu1 %v112_v26 }
  0x49   :  { %278 = vmatpush.msrb.mxu0 %v105_v27  ;;  %298 = vmatpush.msrb.mxu1 %v106_v28 }
  0x4b   :  { %279 = vmatpush.msrb.mxu0 %v99_v29  ;;  %299 = vmatpush.msrb.mxu1 %v100_v30 }
  0x4d   :  { %280 = vmatpush.msrb.mxu0 %v93_v31  ;;  %300 = vmatpush.msrb.mxu1 %v94_v32 }
  0x4e   :  { %281 = vmatmul.f32.vlgmr.msrb.gmra.mxu0 %v82_v8  ;;  %301 = vmatmul.f32.vlgmr.msrb.gmra.mxu1 %v82_v8 }
  0xaf   :  { %v202_v36 = vpop.f32.mrf.mxu0  ;;  %v222_v37 = vpop.f32.mrf.mxu1 }
  0xb0   :  { %v305_v38 = vadd.f32 %v202_v36, %v64_v34  ;;  %v306_v39 = vadd.f32 %v222_v37, %v65_v35 }
  0xb2   :  { %311 = vst [vmem:[#allocation8] sm:$0xff] %v305_v38 }
  0xb3   :  { %312 = vst [vmem:[#allocation8 + $0x8] sm:$0xff] %v306_v39 }
  0xb9   :  { %v242_v42 = vpop.f32.mrf.mxu2  ;;  %v262_v43 = vpop.f32.mrf.mxu3 }
  0xba   :  { %v307_v44 = vadd.f32 %v242_v42, %v66_v40  ;;  %v308_v45 = vadd.f32 %v262_v43, %v67_v41 }
  0xbc   :  { %313 = vst [vmem:[#allocation8 + $0x10] sm:$0xff] %v307_v44 }
  0xbd   :  { %314 = vst [vmem:[#allocation8 + $0x18] sm:$0xff] %v308_v45 }
  0xcb   :  { %v282_v48 = vpop.f32.mrf.mxu0  ;;  %v302_v49 = vpop.f32.mrf.mxu1 }
  0xcc   :  { %v309_v50 = vadd.f32 %v282_v48, %v68_v46  ;;  %v310_v51 = vadd.f32 %v302_v49, %v69_v47 }
  0xce   :  { %315 = vst [vmem:[#allocation8 + $0x20] sm:$0xff] %v309_v50 }
  0xcf   :  { %316 = vst [vmem:[#allocation8 + $0x28] sm:$0xff] %v310_v51 }
  0xd0   :  { %327 = dma.vmem_to_hbm [thread:$0]  %s323_s2, 768, %s325_s30, [#allocation4]  }
  0xd1   :  { %441 = dma.done.wait [#allocation4], 768  }
  0xd2   :  { %442 = vsyncadd [#allocation4], 4294966528 }
  0xd3   :  { %332 = vsyncpa [#allocation3], 1 }
  0xd4   :  { %333 = vsyncpa [#allocation6], 1 }
  0xd5   :  { %334 = vsyncpa [#allocation4], 1 }

</bundles_post_ra>
